<compile_context>
chip_gen: v7x
topology: tpu7x:2x2x1
jax: 0.10.0
libtpu: 0.0.40
codegen_flags: <defaults>
</compile_context>

<pallas_src>
import math
import jax
import jax.numpy as jnp
from jax.experimental import pallas as pl
from jax.experimental.pallas import tpu as pltpu

BN_EPS = 1e-5
NEG_FILL = -1e30


def _round_up(v, m):
    return (v + m - 1) // m * m


def _choose_tiles(n):
    n128 = _round_up(max(n, 1), 128)
    tm = min(256, n128)           # row tile (parallel axis, keeps megacore busy)
    tk = min(1024, n128)          # reduction tile (long DMA bursts)
    lcm = tm * tk // math.gcd(tm, tk)
    n_pad = _round_up(n128, lcm)
    return n_pad, tm, tk


# ---------------------------------------------------------------------------
# Kernel 1: one SAGE layer (mean aggregation + fused linears + ReLU).
# ---------------------------------------------------------------------------
def sage_layer_kernel(a_ref, xk_ref, xi_ref, invdeg_ref, wl_ref, wr_ref, b_ref,
                      out_ref, acc_ref):
    k = pl.program_id(1)

    @pl.when(k == 0)
    def _():
        acc_ref[...] = jnp.zeros_like(acc_ref)

    # Binary/count adjacency tile streamed as int8 (exact), cast once per tile.
    a = a_ref[...].astype(jnp.bfloat16)             # (tm, tk)
    acc_ref[...] += jnp.dot(a, xk_ref[...],          # xk already bf16
                            preferred_element_type=jnp.float32)

    @pl.when(k == pl.num_programs(1) - 1)
    def _():
        # Mean aggregation: scale the neighbor sum by 1/deg in f32.
        agg = (acc_ref[...] * invdeg_ref[...]).astype(jnp.bfloat16)   # (tm, F)
        xi = xi_ref[...]                                              # (tm, F) bf16
        h = (jnp.dot(agg, wl_ref[...], preferred_element_type=jnp.float32)
             + jnp.dot(xi, wr_ref[...], preferred_element_type=jnp.float32)
             + b_ref[...])                  # BatchNorm folded into W/b (f32 bias)
        # dropout(p=0.2) in eval mode -> identity
        out_ref[...] = jnp.maximum(h, 0.0).astype(out_ref.dtype)


def _sage_layer(adj_i8, x_feat, inv_deg, wl, wr, b, *, tm, tk):
    n_pad = adj_i8.shape[0]
    f_in = x_feat.shape[1]
    h_out = wl.shape[1]
    grid = (n_pad // tm, n_pad // tk)
    return pl.pallas_call(
        sage_layer_kernel,
        out_shape=jax.ShapeDtypeStruct((n_pad, h_out), jnp.bfloat16),
        grid_spec=pltpu.PrefetchScalarGridSpec(
            num_scalar_prefetch=0,
            grid=grid,
            in_specs=[
                pl.BlockSpec((tm, tk), lambda i, k: (i, k)),       # A (int8 counts)
                pl.BlockSpec((tk, f_in), lambda i, k: (k, 0)),     # X aggregation rows (bf16)
                pl.BlockSpec((tm, f_in), lambda i, k: (i, 0)),     # X self rows (bf16)
                pl.BlockSpec((tm, 1), lambda i, k: (i, 0)),        # inv_deg (f32)
                pl.BlockSpec((f_in, h_out), lambda i, k: (0, 0)),  # W_l (BN folded, bf16)
                pl.BlockSpec((f_in, h_out), lambda i, k: (0, 0)),  # W_r (BN folded, bf16)
                pl.BlockSpec((1, h_out), lambda i, k: (0, 0)),     # bias (BN folded, f32)
            ],
            out_specs=pl.BlockSpec((tm, h_out), lambda i, k: (i, 0)),
            scratch_shapes=[pltpu.VMEM((tm, f_in), jnp.float32)],
        ),
        compiler_params=pltpu.CompilerParams(
            dimension_semantics=("parallel", "arbitrary"),
        ),
    )(adj_i8, x_feat, x_feat, inv_deg, wl, wr, b)


# ---------------------------------------------------------------------------
# Kernel 2: global mean pool + classifier + log_softmax (lane-dense output).
# ---------------------------------------------------------------------------
def pool_classifier_kernel(p_ref, h_ref, invcnt_ref, wc1_ref, bc1_ref,
                           wc2_ref, bc2_ref, out_ref, acc_ref):
    k = pl.program_id(0)

    @pl.when(k == 0)
    def _():
        acc_ref[...] = jnp.zeros_like(acc_ref)

    # Binary one-hot pool matrix (bf16, exact) x bf16 node features.
    acc_ref[...] += jnp.dot(p_ref[...], h_ref[...],
                            preferred_element_type=jnp.float32)

    @pl.when(k == pl.num_programs(0) - 1)
    def _():
        g = acc_ref[...] * invcnt_ref[...]                                   # mean pool
        c = jnp.dot(g, wc1_ref[...], preferred_element_type=jnp.float32) + bc1_ref[...]
        c = jnp.maximum(c, 0.0)                                              # BN folded, ReLU
        # dropout(p=0.5) in eval mode -> identity
        logits = jnp.dot(c, wc2_ref[...], preferred_element_type=jnp.float32) + bc2_ref[...]
        m = jnp.max(logits, axis=1, keepdims=True)
        z = logits - m
        lse = jnp.log(jnp.sum(jnp.exp(z), axis=1, keepdims=True))
        out_ref[...] = z - lse


def _pool_classify(pool_bf16, h_feat, inv_cnt, wc1, bc1, wc2_pad, bc2_pad, *, tk):
    g_pad, n_pad = pool_bf16.shape
    h_dim = h_feat.shape[1]
    c_pad = wc2_pad.shape[1]
    nk = n_pad // tk
    return pl.pallas_call(
        pool_classifier_kernel,
        out_shape=jax.ShapeDtypeStruct((g_pad, c_pad), jnp.float32),
        grid_spec=pltpu.PrefetchScalarGridSpec(
            num_scalar_prefetch=0,
            grid=(nk,),
            in_specs=[
                pl.BlockSpec((g_pad, tk), lambda k: (0, k)),      # one-hot pool tile (bf16)
                pl.BlockSpec((tk, h_dim), lambda k: (k, 0)),      # node features tile (bf16)
                pl.BlockSpec((g_pad, 1), lambda k: (0, 0)),       # 1/count per graph (f32)
                pl.BlockSpec((h_dim, h_dim), lambda k: (0, 0)),   # classifier W1 (BN folded)
                pl.BlockSpec((1, h_dim), lambda k: (0, 0)),       # classifier b1 (BN folded)
                pl.BlockSpec((h_dim, c_pad), lambda k: (0, 0)),   # classifier W2 (lane-padded)
                pl.BlockSpec((1, c_pad), lambda k: (0, 0)),       # classifier b2 (lane-padded)
            ],
            out_specs=pl.BlockSpec((g_pad, c_pad), lambda k: (0, 0)),
            scratch_shapes=[pltpu.VMEM((g_pad, h_dim), jnp.float32)],
        ),
        compiler_params=pltpu.CompilerParams(
            dimension_semantics=("arbitrary",),
        ),
    )(pool_bf16, h_feat, inv_cnt, wc1, bc1, wc2_pad, bc2_pad)


# ---------------------------------------------------------------------------
# Wrapper: BN folding, hidden/class padding, adjacency & pool construction.
# ---------------------------------------------------------------------------
def fold_eval_params(params, h_pad, c_pad):
    (w1l, b1l, w1r, g1, be1,
     w2l, b2l, w2r, g2, be2,
     wc1, bc1, gc, bec,
     wc2, bc2) = params
    # BatchNorm1d in eval with fresh running stats: mean=0, var=1 -> affine.
    s = jnp.float32(1.0 / math.sqrt(1.0 + BN_EPS))
    s1, s2, sc = g1 * s, g2 * s, gc * s

    def pad2(w, rows, cols):
        return jnp.zeros((rows, cols), jnp.float32).at[:w.shape[0], :w.shape[1]].set(w)

    f_in = w1l.shape[0]
    c = wc2.shape[1]
    # SAGE layer 1 (hidden cols zero-padded to h_pad -> padded lanes stay 0).
    w1l_f = pad2(w1l * s1, f_in, h_pad).astype(jnp.bfloat16)
    w1r_f = pad2(w1r * s1, f_in, h_pad).astype(jnp.bfloat16)
    b1_f = pad2(b1l * s1 + be1, 1, h_pad)
    # SAGE layer 2 (padded hidden rows are zero -> padded inputs contribute 0).
    w2l_f = pad2(w2l * s2, h_pad, h_pad).astype(jnp.bfloat16)
    w2r_f = pad2(w2r * s2, h_pad, h_pad).astype(jnp.bfloat16)
    b2_f = pad2(b2l * s2 + be2, 1, h_pad)
    # Classifier (kept f32; tiny matrices, only run once per graph tile).
    wc1_f = pad2(wc1 * sc, h_pad, h_pad)
    bc1_f = pad2(bc1 * sc + bec, 1, h_pad)
    wc2_p = pad2(wc2, h_pad, c_pad)
    bc2_p = jnp.full((1, c_pad), NEG_FILL, jnp.float32).at[:, :c].set(bc2)
    return (w1l_f, w1r_f, b1_f, w2l_f, w2r_f, b2_f, wc1_f, bc1_f, wc2_p, bc2_p)


def graphsage_forward(x, edge_index, batch, params, num_graphs):
    n, f = x.shape
    n_pad, tm, tk = _choose_tiles(n)
    num_classes = params[-1].shape[-1]
    hidden_dim = params[0].shape[1]
    h_pad = _round_up(hidden_dim, 128)
    g_pad = _round_up(max(num_graphs, 1), 8)
    c_pad = _round_up(num_classes, 128)

    src = edge_index[0].astype(jnp.int32)
    dst = edge_index[1].astype(jnp.int32)

    # Binary/count adjacency built directly in int8 (1 byte/elem HBM stream,
    # exact values); degree vector from the edge list (no N^2 f32 pass).
    ones_i8 = jnp.ones_like(src, dtype=jnp.int8)
    adj = jnp.zeros((n_pad, n_pad), jnp.int8).at[dst, src].add(ones_i8)
    deg = jnp.zeros((n_pad,), jnp.float32).at[dst].add(1.0)
    inv_deg = (1.0 / jnp.maximum(deg, 1.0)).reshape(n_pad, 1)

    # Padded node features, pre-cast to bf16 (MXU operand dtype).
    x_pad = jnp.zeros((n_pad, f), jnp.bfloat16).at[:n, :].set(x.astype(jnp.bfloat16))

    # global_mean_pool: binary one-hot membership (exact in bf16), zero columns
    # for padded nodes; 1/count applied in the kernel epilogue.
    one_hot = (batch[None, :] == jnp.arange(g_pad, dtype=jnp.int32)[:, None])
    counts = jnp.sum(one_hot.astype(jnp.float32), axis=1, keepdims=True)
    inv_cnt = 1.0 / jnp.maximum(counts, 1.0)
    pool = jnp.zeros((g_pad, n_pad), jnp.bfloat16).at[:, :n].set(
        one_hot.astype(jnp.bfloat16))

    (w1l, w1r, b1, w2l, w2r, b2,
     wc1, bc1, wc2_p, bc2_p) = fold_eval_params(params, h_pad, c_pad)

    h1 = _sage_layer(adj, x_pad, inv_deg, w1l, w1r, b1, tm=tm, tk=tk)
    h2 = _sage_layer(adj, h1, inv_deg, w2l, w2r, b2, tm=tm, tk=tk)
    out = _pool_classify(pool, h2, inv_cnt, wc1, bc1, wc2_p, bc2_p, tk=tk)
    return out[:num_graphs, :num_classes]


# ---------------------------------------------------------------------------
# Parameter init (mirrors a freshly constructed PyTorch module).
# ---------------------------------------------------------------------------
def init_params(key, num_features, num_classes, hidden_dim):
    ks = jax.random.split(key, 8)

    def lin(k, fan_in, fan_out):
        bound = 1.0 / math.sqrt(fan_in)
        return jax.random.uniform(k, (fan_in, fan_out), jnp.float32, -bound, bound)

    # SAGEConv1: lin_l (with bias), lin_r (no bias); BatchNorm1d gamma/beta.
    w1l = lin(ks[0], num_features, hidden_dim)
    b1l = jnp.zeros((1, hidden_dim), jnp.float32)
    w1r = lin(ks[1], num_features, hidden_dim)
    g1 = jnp.ones((1, hidden_dim), jnp.float32)
    be1 = jnp.zeros((1, hidden_dim), jnp.float32)
    # SAGEConv2
    w2l = lin(ks[2], hidden_dim, hidden_dim)
    b2l = jnp.zeros((1, hidden_dim), jnp.float32)
    w2r = lin(ks[3], hidden_dim, hidden_dim)
    g2 = jnp.ones((1, hidden_dim), jnp.float32)
    be2 = jnp.zeros((1, hidden_dim), jnp.float32)
    # classifier: Linear -> BN -> ReLU -> Dropout -> Linear
    wc1 = lin(ks[4], hidden_dim, hidden_dim)
    bc1 = jax.random.uniform(ks[5], (1, hidden_dim), jnp.float32,
                             -1.0 / math.sqrt(hidden_dim), 1.0 / math.sqrt(hidden_dim))
    gc = jnp.ones((1, hidden_dim), jnp.float32)
    bec = jnp.zeros((1, hidden_dim), jnp.float32)
    wc2 = lin(ks[6], hidden_dim, num_classes)
    bc2 = jax.random.uniform(ks[7], (1, num_classes), jnp.float32,
                             -1.0 / math.sqrt(hidden_dim), 1.0 / math.sqrt(hidden_dim))

    return (w1l, b1l, w1r, g1, be1,
            w2l, b2l, w2r, g2, be2,
            wc1, bc1, gc, bec,
            wc2, bc2)


# ---------------------------------------------------------------------------
# Pure-JAX reference (f32) for a tolerance check against the kernels.
# ---------------------------------------------------------------------------
def reference_forward(x, edge_index, batch, params, num_graphs):
    (w1l, b1l, w1r, g1, be1,
     w2l, b2l, w2r, g2, be2,
     wc1, bc1, gc, bec,
     wc2, bc2) = params
    n = x.shape[0]
    src, dst = edge_index[0], edge_index[1]
    adj = jnp.zeros((n, n), jnp.float32).at[dst, src].add(1.0)
    deg = jnp.sum(adj, axis=1, keepdims=True)
    a_mean = adj / jnp.maximum(deg, 1.0)
    s = 1.0 / jnp.sqrt(1.0 + BN_EPS)

    h = a_mean @ x @ w1l + b1l + x @ w1r
    h = jnp.maximum(h * (g1 * s) + be1, 0.0)
    h2 = a_mean @ h @ w2l + b2l + h @ w2r
    h2 = jnp.maximum(h2 * (g2 * s) + be2, 0.0)

    one_hot = (batch[None, :] == jnp.arange(num_graphs)[:, None]).astype(jnp.float32)
    pool = one_hot / jnp.maximum(jnp.sum(one_hot, axis=1, keepdims=True), 1.0)
    g = pool @ h2
    c = jnp.maximum((g @ wc1 + bc1) * (gc * s) + bec, 0.0)
    logits = c @ wc2 + bc2
    return jax.nn.log_softmax(logits, axis=1)


if __name__ == "__main__":
    num_features, num_classes, hidden_dim = 8, 4, 64
    nodes_per_graph, num_graphs = 8, 2
    num_nodes = nodes_per_graph * num_graphs

    key = jax.random.PRNGKey(0)
    k_x, k_p = jax.random.split(key)

    # node features (N, F)
    x = jax.random.normal(k_x, (num_nodes, num_features), jnp.float32)

    # two disjoint ring graphs with bidirectional edges
    src_list, dst_list = [], []
    for g in range(num_graphs):
        base = g * nodes_per_graph
        for i in range(nodes_per_graph):
            a, b = base + i, base + (i + 1) % nodes_per_graph
            src_list += [a, b]
            dst_list += [b, a]
    edge_index = jnp.array([src_list, dst_list], dtype=jnp.int32)  # (2, E)
    batch = jnp.repeat(jnp.arange(num_graphs, dtype=jnp.int32), nodes_per_graph)

    params = init_params(k_p, num_features, num_classes, hidden_dim)

    out = graphsage_forward(x, edge_index, batch, params, num_graphs)
    out = jax.block_until_ready(out)

    assert out.shape == (num_graphs, num_classes)
    # rows of log_softmax must exp-sum to 1
    assert bool(jnp.all(jnp.abs(jnp.sum(jnp.exp(out), axis=1) - 1.0) < 1e-4))
    # compare against f32 pure-JAX reference (bf16 operands -> loose tolerance)
    ref = reference_forward(x, edge_index, batch, params, num_graphs)
    assert bool(jnp.allclose(out, ref, atol=5e-2, rtol=5e-2)), (out, ref)
    print("KERNEL_OK")
</pallas_src>

<mosaic_0001>
module attributes {stable_mosaic.version = 11 : i64} {
  func.func @sage_layer_kernel(%arg0: i32, %arg1: i32, %arg2: memref<128x128xi8, #tpu.memory_space<vmem>>, %arg3: memref<128x8xbf16, #tpu.memory_space<vmem>>, %arg4: memref<128x8xbf16, #tpu.memory_space<vmem>>, %arg5: memref<128x1xf32, #tpu.memory_space<vmem>>, %arg6: memref<8x128xbf16, #tpu.memory_space<vmem>>, %arg7: memref<8x128xbf16, #tpu.memory_space<vmem>>, %arg8: memref<1x128xf32, #tpu.memory_space<vmem>>, %arg9: memref<128x128xbf16, #tpu.memory_space<vmem>>, %arg10: memref<128x8xf32, #tpu.memory_space<vmem>>) attributes {dimension_semantics = [#tpu.dimension_semantics<parallel>, #tpu.dimension_semantics<arbitrary>], iteration_bounds = array<i64: 1, 1>, scalar_prefetch = 0 : i64, scratch_operands = 1 : i64, tpu.core_type = #tpu.core_type<tc>, window_params = [{transform_indices = @transform_0, window_bounds = array<i64: 128, 128>}, {transform_indices = @transform_1, window_bounds = array<i64: 128, 8>}, {transform_indices = @transform_2, window_bounds = array<i64: 128, 8>}, {transform_indices = @transform_3, window_bounds = array<i64: 128, 1>}, {pipeline_mode = #tpu.pipeline_mode<synchronous>, transform_indices = @transform_4, window_bounds = array<i64: 8, 128>}, {pipeline_mode = #tpu.pipeline_mode<synchronous>, transform_indices = @transform_5, window_bounds = array<i64: 8, 128>}, {pipeline_mode = #tpu.pipeline_mode<synchronous>, transform_indices = @transform_6, window_bounds = array<i64: 1, 128>}, {transform_indices = @transform_7, window_bounds = array<i64: 128, 128>}]} {
    %c0_i32 = arith.constant 0 : i32
    %0 = arith.cmpi eq, %arg1, %c0_i32 : i32
    %1 = arith.extui %0 : i1 to i32
    %c0_i32_0 = arith.constant 0 : i32
    %2 = arith.cmpi ne, %1, %c0_i32_0 : i32
    scf.if %2 {
      %cst_10 = arith.constant 0.000000e+00 : f32
      %13 = vector.broadcast %cst_10 : f32 to vector<128x8xf32>
      %c0_11 = arith.constant 0 : index
      %c0_12 = arith.constant 0 : index
      %14 = vector.load %arg10[%c0_11, %c0_12] : memref<128x8xf32, #tpu.memory_space<vmem>>, vector<128x8xf32>
      tpu.vector_store %arg10[%c0_11, %c0_12], %13 {strides = array<i32>} : memref<128x8xf32, #tpu.memory_space<vmem>>, vector<128x8xf32>,
    } else {
    }
    %c0 = arith.constant 0 : index
    %c0_1 = arith.constant 0 : index
    %3 = vector.load %arg2[%c0, %c0_1] : memref<128x128xi8, #tpu.memory_space<vmem>>, vector<128x128xi8>
    %4 = arith.sitofp %3 : vector<128x128xi8> to vector<128x128xbf16>
    %c0_2 = arith.constant 0 : index
    %c0_3 = arith.constant 0 : index
    %5 = vector.load %arg10[%c0_2, %c0_3] : memref<128x8xf32, #tpu.memory_space<vmem>>, vector<128x8xf32>
    %c0_4 = arith.constant 0 : index
    %c0_5 = arith.constant 0 : index
    %6 = vector.load %arg3[%c0_4, %c0_5] : memref<128x8xbf16, #tpu.memory_space<vmem>>, vector<128x8xbf16>
    %cst = arith.constant dense<0.000000e+00> : vector<128x8xf32>
    %7 = tpu.matmul %4, %6, %cst {dimension_numbers = #tpu.dot_dimension_numbers<[1], [0], [0], [1], [0, 0, 1, 1], [], []>} : vector<128x128xbf16>, vector<128x8xbf16>, vector<128x8xf32> -> vector<128x8xf32>
    %8 = arith.addf %5, %7 : vector<128x8xf32>
    %c0_6 = arith.constant 0 : index
    %c0_7 = arith.constant 0 : index
    %9 = vector.load %arg10[%c0_6, %c0_7] : memref<128x8xf32, #tpu.memory_space<vmem>>, vector<128x8xf32>
    tpu.vector_store %arg10[%c0_6, %c0_7], %8 {strides = array<i32>} : memref<128x8xf32, #tpu.memory_space<vmem>>, vector<128x8xf32>,
    %c0_i32_8 = arith.constant 0 : i32
    %10 = arith.cmpi eq, %arg1, %c0_i32_8 : i32
    %11 = arith.extui %10 : i1 to i32
    %c0_i32_9 = arith.constant 0 : i32
    %12 = arith.cmpi ne, %11, %c0_i32_9 : i32
    scf.if %12 {
      %c0_10 = arith.constant 0 : index
      %c0_11 = arith.constant 0 : index
      %13 = vector.load %arg10[%c0_10, %c0_11] : memref<128x8xf32, #tpu.memory_space<vmem>>, vector<128x8xf32>
      %c0_12 = arith.constant 0 : index
      %c0_13 = arith.constant 0 : index
      %14 = vector.load %arg5[%c0_12, %c0_13] : memref<128x1xf32, #tpu.memory_space<vmem>>, vector<128x1xf32>
      %15 = vector.broadcast %14 : vector<128x1xf32> to vector<128x8xf32>
      %16 = arith.mulf %13, %15 : vector<128x8xf32>
      %17 = arith.truncf %16 : vector<128x8xf32> to vector<128x8xbf16>
      %c0_14 = arith.constant 0 : index
      %c0_15 = arith.constant 0 : index
      %18 = vector.load %arg4[%c0_14, %c0_15] : memref<128x8xbf16, #tpu.memory_space<vmem>>, vector<128x8xbf16>
      %c0_16 = arith.constant 0 : index
      %c0_17 = arith.constant 0 : index
      %19 = vector.load %arg6[%c0_16, %c0_17] : memref<8x128xbf16, #tpu.memory_space<vmem>>, vector<8x128xbf16>
      %cst_18 = arith.constant dense<0.000000e+00> : vector<128x128xf32>
      %20 = tpu.matmul %17, %19, %cst_18 {dimension_numbers = #tpu.dot_dimension_numbers<[1], [0], [0], [1], [0, 0, 1, 1], [], []>} : vector<128x8xbf16>, vector<8x128xbf16>, vector<128x128xf32> -> vector<128x128xf32>
      %c0_19 = arith.constant 0 : index
      %c0_20 = arith.constant 0 : index
      %21 = vector.load %arg7[%c0_19, %c0_20] : memref<8x128xbf16, #tpu.memory_space<vmem>>, vector<8x128xbf16>
      %cst_21 = arith.constant dense<0.000000e+00> : vector<128x128xf32>
      %22 = tpu.matmul %18, %21, %cst_21 {dimension_numbers = #tpu.dot_dimension_numbers<[1], [0], [0], [1], [0, 0, 1, 1], [], []>} : vector<128x8xbf16>, vector<8x128xbf16>, vector<128x128xf32> -> vector<128x128xf32>
      %23 = arith.addf %20, %22 : vector<128x128xf32>
      %c0_22 = arith.constant 0 : index
      %c0_23 = arith.constant 0 : index
      %24 = vector.load %arg8[%c0_22, %c0_23] : memref<1x128xf32, #tpu.memory_space<vmem>>, vector<1x128xf32>
      %25 = vector.broadcast %24 : vector<1x128xf32> to vector<128x128xf32>
      %26 = arith.addf %23, %25 : vector<128x128xf32>
      %cst_24 = arith.constant 0.000000e+00 : f32
      %27 = vector.broadcast %cst_24 : f32 to vector<128x128xf32>
      %28 = arith.maximumf %26, %27 : vector<128x128xf32>
      %29 = arith.truncf %28 : vector<128x128xf32> to vector<128x128xbf16>
      %c0_25 = arith.constant 0 : index
      %c0_26 = arith.constant 0 : index
      %30 = vector.load %arg9[%c0_25, %c0_26] : memref<128x128xbf16, #tpu.memory_space<vmem>>, vector<128x128xbf16>
      tpu.vector_store %arg9[%c0_25, %c0_26], %29 {strides = array<i32>} : memref<128x128xbf16, #tpu.memory_space<vmem>>, vector<128x128xbf16>,
    } else {
    }
    return
  }
  func.func @transform_0(%arg0: i32, %arg1: i32) -> (i32, i32) {
    %c0_i32 = arith.constant 0 : i32
    return %arg0, %arg1 : i32, i32
  }
  func.func @transform_1(%arg0: i32, %arg1: i32) -> (i32, i32) {
    %c0_i32 = arith.constant 0 : i32
    %c0_i32_0 = arith.constant 0 : i32
    return %arg1, %c0_i32 : i32, i32
  }
  func.func @transform_2(%arg0: i32, %arg1: i32) -> (i32, i32) {
    %c0_i32 = arith.constant 0 : i32
    %c0_i32_0 = arith.constant 0 : i32
    return %arg0, %c0_i32 : i32, i32
  }
  func.func @transform_3(%arg0: i32, %arg1: i32) -> (i32, i32) {
    %c0_i32 = arith.constant 0 : i32
    %c0_i32_0 = arith.constant 0 : i32
    return %arg0, %c0_i32 : i32, i32
  }
  func.func @transform_4(%arg0: i32, %arg1: i32) -> (i32, i32) {
    %c0_i32 = arith.constant 0 : i32
    %c0_i32_0 = arith.constant 0 : i32
    %c0_i32_1 = arith.constant 0 : i32
    return %c0_i32, %c0_i32_0 : i32, i32
  }
  func.func @transform_5(%arg0: i32, %arg1: i32) -> (i32, i32) {
    %c0_i32 = arith.constant 0 : i32
    %c0_i32_0 = arith.constant 0 : i32
    %c0_i32_1 = arith.constant 0 : i32
    return %c0_i32, %c0_i32_0 : i32, i32
  }
  func.func @transform_6(%arg0: i32, %arg1: i32) -> (i32, i32) {
    %c0_i32 = arith.constant 0 : i32
    %c0_i32_0 = arith.constant 0 : i32
    %c0_i32_1 = arith.constant 0 : i32
    return %c0_i32, %c0_i32_0 : i32, i32
  }
  func.func @transform_7(%arg0: i32, %arg1: i32) -> (i32, i32) {
    %c0_i32 = arith.constant 0 : i32
    %c0_i32_0 = arith.constant 0 : i32
    return %arg0, %c0_i32 : i32, i32
  }
}

</mosaic_0001>

<bundles_post_ra>
// kernel: tpu_custom_call.1
= control target key start
LH: loop header
LB: loop body
LE: loop exit
PB: predicated region body
PF: predicated region fallthrough
CT: control target
= control target key end

     0   :  { %v1131_v2 = vmov 0   ;;  %vm492_vm0 = vcmask 1043456   ;;  %vm32_vm1 = vcmask 64512   ;;  %s1361_s0 = inlined_call_operand.vmem [shape: s8[128,128], index: 0, kind: input, shape index: {}]   ;;  %s1362_s1 = inlined_call_operand.vmem [shape: bf16[128,8], index: 1, kind: input, shape index: {}]   ;;  %s1363_s2 = inlined_call_operand.vmem [shape: bf16[128,8], index: 2, kind: input, shape index: {}]   ;;  %s1364_s3 = inlined_call_operand.vmem [shape: f32[128,1], index: 3, kind: input, shape index: {}]   ;;  %s1365_s4 = inlined_call_operand.vmem [shape: bf16[8,128], index: 4, kind: input, shape index: {}]   ;;  %s1366_s5 = inlined_call_operand.vmem [shape: bf16[8,128], index: 5, kind: input, shape index: {}]   ;;  %s1367_s6 = inlined_call_operand.vmem [shape: f32[1,128], index: 6, kind: input, shape index: {}]   ;;  %s1368_s7 = inlined_call_operand.hbm [shape: bf16[128,128], index: 7, kind: output, shape index: {}]  }
   0x1   :  { %v1091_v0 = vld [vmem:[%s1362_s1] sm:$0xff]   ;;  %v1092_v1 = vld [vmem:[%s1362_s1 + $0x8] sm:$0xff]   ;;  %1089 = vset.pattern.permute.xlu0 %v1131_v2  ;;  %1090 = vset.pattern.permute.xlu1 %v1131_v2  ;;  %v1093_v3 = vld [vmem:[%s1362_s1 + $0x10] sm:$0xff]  }
   0x2   :  { %998 = vmatprep.subr.bf16.mxu0 %v1091_v0  ;;  %v1094_v4 = vld [vmem:[%s1362_s1 + $0x18] sm:$0xff]   ;;  %v1191_v5 = vld [vmem:[%s1361_s0] sm:$0xff]  ;;  %v292_v8 = vld [vmem:[%s1364_s3 + $0x10] sm:$0xff] }
   0x3   :  { %999 = vmatpush3.bf16.msra.mxu0 %v1091_v0  ;;  %v53_v6 = vunpack.c.l.s8.bf16 %v1191_v5  ;;  %v290_v7 = vld [vmem:[%s1364_s3] sm:$0xff]  ;;  %318 = vperm.xlu1 %1090, %v292_v8   ;;  %v291_v9 = vld [vmem:[%s1364_s3 + $0x8] sm:$0xff]  ;;  %v293_v10 = vld [vmem:[%s1364_s3 + $0x18] sm:$0xff] }
   0x4   :  { %1000 = vmatprep.subr.bf16.mxu0 %v1092_v1  ;;  %308 = vperm.xlu0 %1089, %v290_v7   ;;  %v1095_v11 = vld [vmem:[%s1362_s1 + $0x20] sm:$0xff]   ;;  %v1096_v12 = vld [vmem:[%s1362_s1 + $0x28] sm:$0xff]   ;;  %v296_v19 = vld [vmem:[%s1364_s3 + $0x30] sm:$0xff] }
   0x5   :  { %1014 = vmatprep.mubr.bf16.mxu0 %v53_v6  ;;  %v294_v13 = vld [vmem:[%s1364_s3 + $0x20] sm:$0xff]  ;;  %v295_v14 = vld [vmem:[%s1364_s3 + $0x28] sm:$0xff]  ;;  %v297_v20 = vld [vmem:[%s1364_s3 + $0x38] sm:$0xff] }
   0x6   :  { %v427_v15 = vld [vmem:[%s1366_s5] sm:$0xf]  ;;  %v1100_v21 = vld [vmem:[%s1363_s2 + $0x8] sm:$0xff]   ;;  %v1097_v23 = vld [vmem:[%s1362_s1 + $0x30] sm:$0xff]  }
   0x7   :  { %1001 = vmatpush3.bf16.msra.mxu0 %v1092_v1  ;;  %323 = vperm.xlu1 %1090, %v293_v10   ;;  %v494_v16 = vsel %vm492_vm0, %v427_v15, 0  ;;  %v426_v17 = vld [vmem:[%s1365_s4] sm:$0xf]  ;;  %v1101_v24 = vld [vmem:[%s1363_s2 + $0x10] sm:$0xff]  }
   0x8   :  { %1002 = vmatprep.subr.bf16.mxu0 %v1093_v3  ;;  %313 = vperm.xlu0 %1089, %v291_v9   ;;  %v1099_v18 = vld [vmem:[%s1363_s2] sm:$0xff]   ;;  %v618_v22 = vsel %vm492_vm0, %v426_v17, 0 }
   0x9   :  { %1082 = vmatprep.subr.msk.bf16.mxu1 %vm492_vm0, %v427_v15  ;;  %1032 = vmatprep.mubr.msk.bf16.mxu1 %vm32_vm1, %v1099_v18 }
   0xa   :  { %1031 = vmatpush3.bf16.msra.mxu1 %v494_v16 }
   0xb   :  { %1003 = vmatpush3.bf16.msra.mxu0 %v1093_v3  ;;  %1083 = vmatprep.subr.msk.bf16.mxu1 %vm492_vm0, %v426_v17 }
   0xc   :  { %1004 = vmatprep.subr.bf16.mxu0 %v1094_v4  ;;  %328 = vperm.xlu0 %1089, %v294_v13  }
   0xd   :  { %333 = vperm.xlu1 %1090, %v295_v14   ;;  %1033 = vmatmul.mubr.msk.bf16.vlgmr.msra.gmra.mrb[0].mxu1 %vm32_vm1, %v1100_v21 }
   0xe   :  { %1049 = vmatpush3.bf16.msra.mxu1 %v618_v22 }
   0xf   :  { %1005 = vmatpush3.bf16.msra.mxu0 %v1094_v4 }
  0x10   :  { %1006 = vmatprep.subr.bf16.mxu0 %v1095_v11  ;;  %338 = vperm.xlu0 %1089, %v296_v19  }
  0x11   :  { %343 = vperm.xlu1 %1090, %v297_v20  }
  0x13   :  { %1007 = vmatpush3.bf16.msra.mxu0 %v1095_v11 }
  0x14   :  { %1008 = vmatprep.subr.bf16.mxu0 %v1096_v12 }
  0x15   :  { %12 = vsyncpa [#allocation4], 0  ;;  %v298_v25 = vld [vmem:[%s1364_s3 + $0x40] sm:$0xff]  ;;  %v299_v26 = vld [vmem:[%s1364_s3 + $0x48] sm:$0xff]  ;;  %1036 = vmatprep.mubr.msk.bf16.mxu1 %vm32_vm1, %v1101_v24  ;;  %v1132_v29 = vmov 0.0   ;;  %v54_v33 = vunpack.c.h.s8.bf16 %v1191_v5 }
  0x16   :  { %v1102_v27 = vld [vmem:[%s1363_s2 + $0x18] sm:$0xff]   ;;  %348 = vperm.xlu0 %1089, %v298_v25   ;;  %353 = vperm.xlu1 %1090, %v299_v26   ;;  %35 = vst.msk [vmem:[#allocation2 + $0x10] sm:$0xff] %vm32_vm1, %v1132_v29  ;;  %33 = vst.msk [vmem:[#allocation2] sm:$0xff] %vm32_vm1, %v1132_v29  ;;  %v300_v30 = vld [vmem:[%s1364_s3 + $0x50] sm:$0xff] }
  0x17   :  { %1009 = vmatpush3.bf16.msra.mxu0 %v1096_v12  ;;  %v1098_v28 = vld [vmem:[%s1362_s1 + $0x38] sm:$0xff]   ;;  %34 = vst.msk [vmem:[#allocation2 + $0x8] sm:$0xff] %vm32_vm1, %v1132_v29  ;;  %36 = vst.msk [vmem:[#allocation2 + $0x18] sm:$0xff] %vm32_vm1, %v1132_v29  ;;  %1037 = vmatmul.mubr.msk.bf16.gmra.mrb[4].mxu1 %vm32_vm1, %v1102_v27  ;;  %v50_v32 = vld [vmem:[%s1361_s0 + $0x8] sm:$0xff] }
  0x18   :  { %1010 = vmatprep.subr.bf16.mxu0 %v1097_v23  ;;  %37 = vst.msk [vmem:[#allocation2 + $0x20] sm:$0xff] %vm32_vm1, %v1132_v29  ;;  %38 = vst.msk [vmem:[#allocation2 + $0x28] sm:$0xff] %vm32_vm1, %v1132_v29  ;;  %v301_v31 = vld [vmem:[%s1364_s3 + $0x58] sm:$0xff]  ;;  %v55_v34 = vunpack.c.l.s8.bf16 %v50_v32  ;;  %v302_v35 = vld [vmem:[%s1364_s3 + $0x60] sm:$0xff]  ;;  %v56_v40 = vunpack.c.h.s8.bf16 %v50_v32 }
  0x19   :  { %39 = vst.msk [vmem:[#allocation2 + $0x30] sm:$0xff] %vm32_vm1, %v1132_v29  ;;  %40 = vst.msk [vmem:[#allocation2 + $0x38] sm:$0xff] %vm32_vm1, %v1132_v29  ;;  %v303_v36 = vld [vmem:[%s1364_s3 + $0x68] sm:$0xff]  ;;  %v304_v37 = vld [vmem:[%s1364_s3 + $0x70] sm:$0xff] }
  0x1a   :  { %41 = vst.msk [vmem:[#allocation2 + $0x40] sm:$0xff] %vm32_vm1, %v1132_v29  ;;  %42 = vst.msk [vmem:[#allocation2 + $0x48] sm:$0xff] %vm32_vm1, %v1132_v29  ;;  %358 = vperm.xlu0 %1089, %v300_v30   ;;  %363 = vperm.xlu1 %1090, %v301_v31   ;;  %v51_v38 = vld [vmem:[%s1361_s0 + $0x10] sm:$0xff]  ;;  %v305_v39 = vld [vmem:[%s1364_s3 + $0x78] sm:$0xff] }
  0x1b   :  { %43 = vst.msk [vmem:[#allocation2 + $0x50] sm:$0xff] %vm32_vm1, %v1132_v29  ;;  %44 = vst.msk [vmem:[#allocation2 + $0x58] sm:$0xff] %vm32_vm1, %v1132_v29  ;;  %1011 = vmatpush3.bf16.msra.mxu0 %v1097_v23  ;;  %v57_v41 = vunpack.c.l.s8.bf16 %v51_v38  ;;  %v52_v42 = vld [vmem:[%s1361_s0 + $0x18] sm:$0xff]  ;;  %v58_v43 = vunpack.c.h.s8.bf16 %v51_v38  ;;  %v1103_v46 = vld [vmem:[%s1363_s2 + $0x20] sm:$0xff]  }
  0x1c   :  { %45 = vst.msk [vmem:[#allocation2 + $0x60] sm:$0xff] %vm32_vm1, %v1132_v29  ;;  %46 = vst.msk [vmem:[#allocation2 + $0x68] sm:$0xff] %vm32_vm1, %v1132_v29  ;;  %1012 = vmatprep.subr.bf16.mxu0 %v1098_v28  ;;  %v59_v44 = vunpack.c.l.s8.bf16 %v52_v42  ;;  %v60_v45 = vunpack.c.h.s8.bf16 %v52_v42  ;;  %v1104_v47 = vld [vmem:[%s1363_s2 + $0x28] sm:$0xff]   ;;  %1040 = vmatprep.mubr.msk.bf16.mxu1 %vm32_vm1, %v1103_v46  ;;  %v1105_v48 = vld [vmem:[%s1363_s2 + $0x30] sm:$0xff]  }
  0x1d   :  { %47 = vst.msk [vmem:[#allocation2 + $0x70] sm:$0xff] %vm32_vm1, %v1132_v29  ;;  %48 = vst.msk [vmem:[#allocation2 + $0x78] sm:$0xff] %vm32_vm1, %v1132_v29  ;;  %v1106_v49 = vld [vmem:[%s1363_s2 + $0x38] sm:$0xff]   ;;  %v63_v52 = vld [vmem:[#allocation2 + $0x10] sm:$0xff] }
  0x1e   :  { %368 = vperm.xlu0 %1089, %v302_v35   ;;  %373 = vperm.xlu1 %1090, %v303_v36   ;;  %v61_v53 = vld [vmem:[#allocation2] sm:$0xff]  ;;  %v64_v56 = vld [vmem:[#allocation2 + $0x18] sm:$0xff]  ;;  %v62_v59 = vld [vmem:[#allocation2 + $0x8] sm:$0xff] }
  0x1f   :  { %1013 = vmatpush3.bf16.msra.mxu0 %v1098_v28  ;;  %1041 = vmatmul.mubr.msk.bf16.gmra.mrb[8].mxu1 %vm32_vm1, %v1104_v47  ;;  %v65_v4 = vld [vmem:[#allocation2 + $0x20] sm:$0xff]  ;;  %v66_v10 = vld [vmem:[#allocation2 + $0x28] sm:$0xff] }
  0x20   :  { %1044 = vmatprep.mubr.msk.bf16.mxu1 %vm32_vm1, %v1105_v48  ;;  %v67_v3 = vld [vmem:[#allocation2 + $0x30] sm:$0xff]  ;;  %v68_v7 = vld [vmem:[#allocation2 + $0x38] sm:$0xff] }
  0x21   :  { %v69_v26 = vld [vmem:[#allocation2 + $0x40] sm:$0xff] }
  0x22   :  { %1015 = vmatmul.mubr.bf16.vlgmr.msra.gmra.mrb[0].mxu0 %v54_v33  ;;  %378 = vperm.xlu0 %1089, %v304_v37   ;;  %v71_v23 = vld [vmem:[#allocation2 + $0x50] sm:$0xff]  ;;  %v72_v29 = vld [vmem:[#allocation2 + $0x58] sm:$0xff]  ;;  %v70_v33 = vld [vmem:[#allocation2 + $0x48] sm:$0xff] }
  0x23   :  { %1018 = vmatprep.mubr.bf16.mxu0 %v55_v34  ;;  %383 = vperm.xlu1 %1090, %v305_v39  }
  0x24   :  { %v75_v47 = vld [vmem:[#allocation2 + $0x70] sm:$0xff] }
  0x27   :  { %1045 = vmatmul.mubr.msk.bf16.gmra.mrb[12].mxu1 %vm32_vm1, %v1106_v49 }
  0x2a   :  { %1019 = vmatmul.mubr.bf16.gmra.mrb[4].mxu0 %v56_v40 }
  0x2b   :  { %1022 = vmatprep.mubr.bf16.mxu0 %v57_v41 }
  0x32   :  { %1023 = vmatmul.mubr.bf16.gmra.mrb[8].mxu0 %v58_v43 }
  0x33   :  { %1026 = vmatprep.mubr.bf16.mxu0 %v59_v44 }
  0x3a   :  { %1027 = vmatmul.mubr.bf16.gmra.mrb[12].mxu0 %v60_v45 }
  0x82   :  { %v319_v50 = vpop.permute.xlu1 %318 }
  0x83   :  { %v309_v51 = vpop.permute.xlu0 %308 }
  0x86   :  { %v324_v54 = vpop.permute.xlu1 %323 }
  0x87   :  { %v314_v60 = vpop.permute.xlu0 %313 }
  0x8b   :  { %v329_v5 = vpop.permute.xlu0 %328 }
  0x8c   :  { %v334_v2 = vpop.permute.xlu1 %333 }
  0x8f   :  { %v339_v22 = vpop.permute.xlu0 %338 }
  0x90   :  { %v344_v16 = vpop.permute.xlu1 %343 }
  0x95   :  { %v354_v35 = vpop.permute.xlu1 %353  ;;  %v349_v41 = vpop.permute.xlu0 %348 }
  0xf5   :  { %v1016_v55 = vpop.f32.mrb[0].mxu0 }
  0xf6   :  { %v240_v57 = vadd.f32 %v1016_v55, %v63_v52  ;;  %v175_v58 = vpop.f32.mrb[1].mxu0  ;;  %v364_v52 = vpop.permute.xlu1 %363 }
  0xf7   :  { %v238_v61 = vadd.f32 %v175_v58, %v61_v53  ;;  %v1017_v62 = vpop.f32.mrb[2].mxu0  ;;  %v74_v58 = vld [vmem:[#allocation2 + $0x68] sm:$0xff] }
  0xf8   :  { %257 = vst.msk [vmem:[#allocation2 + $0x10] sm:$0xff] %vm32_vm1, %v240_v57  ;;  %v241_v63 = vadd.f32 %v1017_v62, %v64_v56  ;;  %v178_v0 = vpop.f32.mrb[3].mxu0 }
  0xf9   :  { %255 = vst.msk [vmem:[#allocation2] sm:$0xff] %vm32_vm1, %v238_v61  ;;  %v239_v1 = vadd.f32 %v178_v0, %v62_v59 }
  0xfa   :  { %258 = vst.msk [vmem:[#allocation2 + $0x18] sm:$0xff] %vm32_vm1, %v241_v63 }
  0xfb   :  { %256 = vst.msk [vmem:[#allocation2 + $0x8] sm:$0xff] %vm32_vm1, %v239_v1 }
  0xfd   :  { %v1020_v6 = vpop.f32.mrb[4].mxu0 }
  0xfe   :  { %v244_v8 = vadd.f32 %v1020_v6, %v67_v3  ;;  %v191_v9 = vpop.f32.mrb[5].mxu0 }
  0xff   :  { %v242_v11 = vadd.f32 %v191_v9, %v65_v4  ;;  %v1021_v12 = vpop.f32.mrb[6].mxu0  ;;  %v276_v18 = vld [vmem:[#allocation2 + $0x10] sm:$0xff] }
 0x100   :  { %261 = vst.msk [vmem:[#allocation2 + $0x30] sm:$0xff] %vm32_vm1, %v244_v8  ;;  %v245_v13 = vadd.f32 %v1021_v12, %v68_v7  ;;  %v194_v14 = vpop.f32.mrb[7].mxu0  ;;  %v274_v15 = vld [vmem:[#allocation2] sm:$0xff]  ;;  %v388_v27 = vmul.f32 %v319_v50, %v276_v18  ;;  %v374_v7 = vpop.permute.xlu1 %373 }
 0x101   :  { %259 = vst.msk [vmem:[#allocation2 + $0x20] sm:$0xff] %vm32_vm1, %v242_v11  ;;  %v243_v17 = vadd.f32 %v194_v14, %v66_v10  ;;  %v277_v19 = vld [vmem:[#allocation2 + $0x18] sm:$0xff]  ;;  %v386_v24 = vmul.f32 %v309_v51, %v274_v15  ;;  %v73_v50 = vld [vmem:[#allocation2 + $0x60] sm:$0xff] }
 0x102   :  { %262 = vst.msk [vmem:[#allocation2 + $0x38] sm:$0xff] %vm32_vm1, %v245_v13  ;;  %v275_v20 = vld [vmem:[#allocation2 + $0x8] sm:$0xff]  ;;  %v389_v21 = vmul.f32 %v324_v54, %v277_v19  ;;  %v76_v54 = vld [vmem:[#allocation2 + $0x78] sm:$0xff] }
 0x103   :  { %260 = vst.msk [vmem:[#allocation2 + $0x28] sm:$0xff] %vm32_vm1, %v243_v17  ;;  %v387_v25 = vmul.f32 %v314_v60, %v275_v20  ;;  %v359_v60 = vpop.permute.xlu0 %358 }
 0x104   :  { %v403_v34 = vpack.c.bf16 %v389_v21, %v388_v27  ;;  %v384_v15 = vpop.permute.xlu1 %383 }
 0x105   :  { %v1024_v28 = vpop.f32.mrb[8].mxu0  ;;  %v402_v30 = vpack.c.bf16 %v387_v25, %v386_v24 }
 0x106   :  { %v248_v31 = vadd.f32 %v1024_v28, %v71_v23  ;;  %v207_v32 = vpop.f32.mrb[9].mxu0 }
 0x107   :  { %v246_v36 = vadd.f32 %v207_v32, %v69_v26  ;;  %v1025_v37 = vpop.f32.mrb[10].mxu0  ;;  %1050 = vmatprep.mubr.msk.bf16.mxu1 %vm32_vm1, %v402_v30  ;;  %v280_v43 = vld [vmem:[#allocation2 + $0x30] sm:$0xff]  ;;  %v369_v11 = vpop.permute.xlu0 %368  ;;  %v884_v26 = vld [vmem:[%s1367_s6] ss:$0 sm:$0xff]  ;;  %s1133_s6 = smov [#allocation3]  }
 0x108   :  { %265 = vst.msk [vmem:[#allocation2 + $0x50] sm:$0xff] %vm32_vm1, %v248_v31  ;;  %v249_v38 = vadd.f32 %v1025_v37, %v72_v29  ;;  %v210_v39 = vpop.f32.mrb[11].mxu0  ;;  %1051 = vmatmul.mubr.msk.bf16.vlgmr.msra.gmra.mrb[0].mxu1 %vm32_vm1, %v403_v34  ;;  %v278_v40 = vld [vmem:[#allocation2 + $0x20] sm:$0xff]  ;;  %v392_v51 = vmul.f32 %v339_v22, %v280_v43  ;;  %s841_s25 = sshll.u32 %s1133_s6, 4  ;;  %s842_s25 = int_to_ptr.vmem [resolvable:$true] %s841_s25 }
 0x109   :  { %263 = vst.msk [vmem:[#allocation2 + $0x40] sm:$0xff] %vm32_vm1, %v246_v36  ;;  %v247_v42 = vadd.f32 %v210_v39, %v70_v33  ;;  %v281_v44 = vld [vmem:[#allocation2 + $0x38] sm:$0xff]  ;;  %v390_v48 = vmul.f32 %v329_v5, %v278_v40  ;;  %s1107_s1 = scalar_lea.vmem %s842_s25, 1024  ;;  %p1112_p1 = scmp.lt.s32.totalorder %s842_s25, %s842_s25 }
 0x10a   :  { %266 = vst.msk [vmem:[#allocation2 + $0x58] sm:$0xff] %vm32_vm1, %v249_v38  ;;  %v279_v45 = vld [vmem:[#allocation2 + $0x28] sm:$0xff]  ;;  %v393_v46 = vmul.f32 %v344_v16, %v281_v44  ;;  %p1108_p0 = scmp.ne.s32.totalorder %s842_s25, %s1107_s1  ;;  %p1113_p2 = scmp.lt.s32.totalorder %s1107_s1, %s1107_s1 }
 0x10b   :  { %264 = vst.msk [vmem:[#allocation2 + $0x48] sm:$0xff] %vm32_vm1, %v247_v42  ;;  %v391_v49 = vmul.f32 %v334_v2, %v279_v45  ;;  %v379_v20 = vpop.permute.xlu0 %378 }
 0x10c   :  { %v405_v59 = vpack.c.bf16 %v393_v46, %v392_v51  ;;  %p1114_p3 = por %p1113_p2, %p1112_p1 }
 0x10d   :  { %v1028_v53 = vpop.f32.mrb[12].mxu0  ;;  %v404_v55 = vpack.c.bf16 %v391_v49, %v390_v48 }
 0x10e   :  { %v252_v56 = vadd.f32 %v1028_v53, %v75_v47  ;;  %v223_v57 = vpop.f32.mrb[13].mxu0  ;;  %p1115_p4 = pnand %p1114_p3, %p1108_p0 }
 0x10f   :  { %v250_v61 = vadd.f32 %v223_v57, %v73_v50  ;;  %v1029_v62 = vpop.f32.mrb[14].mxu0  ;;  %1054 = vmatprep.mubr.msk.bf16.mxu1 %vm32_vm1, %v404_v55  ;;  %v284_v3 = vld [vmem:[#allocation2 + $0x50] sm:$0xff] }
 0x110   :  { %269 = vst.msk [vmem:[#allocation2 + $0x70] sm:$0xff] %vm32_vm1, %v252_v56  ;;  %v253_v63 = vadd.f32 %v1029_v62, %v76_v54  ;;  %v226_v0 = vpop.f32.mrb[15].mxu0  ;;  %1055 = vmatmul.mubr.msk.bf16.gmra.mrb[4].mxu1 %vm32_vm1, %v405_v59  ;;  %v282_v1 = vld [vmem:[#allocation2 + $0x40] sm:$0xff]  ;;  %v396_v10 = vmul.f32 %v359_v60, %v284_v3 }
 0x111   :  { %267 = vst.msk [vmem:[#allocation2 + $0x60] sm:$0xff] %vm32_vm1, %v250_v61  ;;  %v251_v2 = vadd.f32 %v226_v0, %v74_v58  ;;  %v285_v4 = vld [vmem:[#allocation2 + $0x58] sm:$0xff]  ;;  %v394_v8 = vmul.f32 %v349_v41, %v282_v1 }
 0x112   :  { %270 = vst.msk [vmem:[#allocation2 + $0x78] sm:$0xff] %vm32_vm1, %v253_v63  ;;  %v283_v5 = vld [vmem:[#allocation2 + $0x48] sm:$0xff]  ;;  %v397_v6 = vmul.f32 %v364_v52, %v285_v4 }
 0x113   :  { %268 = vst.msk [vmem:[#allocation2 + $0x68] sm:$0xff] %vm32_vm1, %v251_v2  ;;  %v395_v9 = vmul.f32 %v354_v35, %v283_v5 }
 0x114   :  { %v407_v13 = vpack.c.bf16 %v397_v6, %v396_v10 }
 0x115   :  { %v406_v12 = vpack.c.bf16 %v395_v9, %v394_v8 }
 0x117   :  { %1058 = vmatprep.mubr.msk.bf16.mxu1 %vm32_vm1, %v406_v12  ;;  %v288_v16 = vld [vmem:[#allocation2 + $0x70] sm:$0xff] }
 0x118   :  { %1059 = vmatmul.mubr.msk.bf16.gmra.mrb[8].mxu1 %vm32_vm1, %v407_v13  ;;  %v286_v14 = vld [vmem:[#allocation2 + $0x60] sm:$0xff]  ;;  %v400_v23 = vmul.f32 %v379_v20, %v288_v16 }
 0x119   :  { %v289_v17 = vld [vmem:[#allocation2 + $0x78] sm:$0xff]  ;;  %v398_v21 = vmul.f32 %v369_v11, %v286_v14 }
 0x11a   :  { %v287_v18 = vld [vmem:[#allocation2 + $0x68] sm:$0xff]  ;;  %v401_v19 = vmul.f32 %v384_v15, %v289_v17 }
 0x11b   :  { %v399_v22 = vmul.f32 %v374_v7, %v287_v18 }
 0x11c   :  { %v409_v25 = vpack.c.bf16 %v401_v19, %v400_v23 }
 0x11d   :  { %v408_v24 = vpack.c.bf16 %v399_v22, %v398_v21 }
 0x11f   :  { %1062 = vmatprep.mubr.msk.bf16.mxu1 %vm32_vm1, %v408_v24 }
 0x120   :  { %1063 = vmatmul.mubr.msk.bf16.gmra.mrb[12].mxu1 %vm32_vm1, %v409_v25 }
 0x1db   :  { %v1052_v27 = vpop.f32.mrb[0].mxu1 }
 0x1dc   :  { %v726_v28 = vadd.f32 %v1052_v27, %v884_v26  ;;  %v654_v29 = vpop.f32.mrb[1].mxu1 }
 0x1dd   :  { %v724_v30 = vadd.f32 %v884_v26, %v654_v29  ;;  %v1053_v31 = vpop.f32.mrb[2].mxu1 }
 0x1de   :  { %v727_v32 = vadd.f32 %v1053_v31, %v884_v26  ;;  %v657_v33 = vpop.f32.mrb[3].mxu1  ;;  %v742_v35 = vmax.f32 %v726_v28, 0.0 }
 0x1df   :  { %v725_v34 = vadd.f32 %v884_v26, %v657_v33  ;;  %v740_v37 = vmax.f32 %v724_v30, 0.0 }
 0x1e0   :  { %v743_v36 = vmax.f32 %v727_v32, 0.0 }
 0x1e1   :  { %v741_v38 = vmax.f32 %v725_v34, 0.0 }
 0x1e2   :  { %v925_v39 = vpack.c.bf16 %v743_v36, %v742_v35 }
 0x1e3   :  { %v920_v40 = vpack.c.bf16 %v741_v38, %v740_v37  ;;  %v1056_v41 = vpop.f32.mrb[4].mxu1 }
 0x1e4   :  { %957 = vst [vmem:[#allocation3 + $0x8] sm:$0xff] %v925_v39   ;;  %v730_v42 = vadd.f32 %v1056_v41, %v884_v26  ;;  %v670_v43 = vpop.f32.mrb[5].mxu1 }
 0x1e5   :  { %921 = vst [vmem:[#allocation3] sm:$0xff] %v920_v40   ;;  %v728_v44 = vadd.f32 %v884_v26, %v670_v43  ;;  %v1057_v45 = vpop.f32.mrb[6].mxu1 }
 0x1e6   :  { %v731_v46 = vadd.f32 %v1057_v45, %v884_v26  ;;  %v673_v47 = vpop.f32.mrb[7].mxu1  ;;  %v746_v49 = vmax.f32 %v730_v42, 0.0 }
 0x1e7   :  { %v729_v48 = vadd.f32 %v884_v26, %v673_v47  ;;  %v744_v51 = vmax.f32 %v728_v44, 0.0 }
 0x1e8   :  { %v747_v50 = vmax.f32 %v731_v46, 0.0 }
 0x1e9   :  { %v745_v52 = vmax.f32 %v729_v48, 0.0 }
 0x1ea   :  { %v935_v53 = vpack.c.bf16 %v747_v50, %v746_v49 }
 0x1eb   :  { %v930_v54 = vpack.c.bf16 %v745_v52, %v744_v51  ;;  %v1060_v55 = vpop.f32.mrb[8].mxu1 }
 0x1ec   :  { %959 = vst [vmem:[#allocation3 + $0x18] sm:$0xff] %v935_v53   ;;  %v734_v56 = vadd.f32 %v1060_v55, %v884_v26  ;;  %v686_v57 = vpop.f32.mrb[9].mxu1 }
 0x1ed   :  { %958 = vst [vmem:[#allocation3 + $0x10] sm:$0xff] %v930_v54   ;;  %v732_v58 = vadd.f32 %v884_v26, %v686_v57  ;;  %v1061_v59 = vpop.f32.mrb[10].mxu1 }
 0x1ee   :  { %v735_v60 = vadd.f32 %v1061_v59, %v884_v26  ;;  %v689_v61 = vpop.f32.mrb[11].mxu1  ;;  %v750_v63 = vmax.f32 %v734_v56, 0.0 }
 0x1ef   :  { %v733_v62 = vadd.f32 %v884_v26, %v689_v61  ;;  %v748_v1 = vmax.f32 %v732_v58, 0.0 }
 0x1f0   :  { %v751_v0 = vmax.f32 %v735_v60, 0.0 }
 0x1f1   :  { %v749_v2 = vmax.f32 %v733_v62, 0.0 }
 0x1f2   :  { %v945_v3 = vpack.c.bf16 %v751_v0, %v750_v63 }
 0x1f3   :  { %v940_v4 = vpack.c.bf16 %v749_v2, %v748_v1  ;;  %v1064_v5 = vpop.f32.mrb[12].mxu1 }
 0x1f4   :  { %961 = vst [vmem:[#allocation3 + $0x28] sm:$0xff] %v945_v3   ;;  %v738_v6 = vadd.f32 %v1064_v5, %v884_v26  ;;  %v702_v7 = vpop.f32.mrb[13].mxu1 }
 0x1f5   :  { %960 = vst [vmem:[#allocation3 + $0x20] sm:$0xff] %v940_v4   ;;  %v736_v8 = vadd.f32 %v884_v26, %v702_v7  ;;  %v1065_v9 = vpop.f32.mrb[14].mxu1 }
 0x1f6   :  { %v739_v10 = vadd.f32 %v1065_v9, %v884_v26  ;;  %v705_v11 = vpop.f32.mrb[15].mxu1  ;;  %v754_v13 = vmax.f32 %v738_v6, 0.0 }
 0x1f7   :  { %v737_v12 = vadd.f32 %v884_v26, %v705_v11  ;;  %v752_v15 = vmax.f32 %v736_v8, 0.0 }
 0x1f8   :  { %v755_v14 = vmax.f32 %v739_v10, 0.0 }
 0x1f9   :  { %v753_v16 = vmax.f32 %v737_v12, 0.0 }
 0x1fa   :  { %v955_v17 = vpack.c.bf16 %v755_v14, %v754_v13 }
 0x1fb   :  { %v950_v18 = vpack.c.bf16 %v753_v16, %v752_v15 }
 0x1fc   :  { %963 = vst [vmem:[#allocation3 + $0x38] sm:$0xff] %v955_v17  }
 0x1fd   :  { %962 = vst [vmem:[#allocation3 + $0x30] sm:$0xff] %v950_v18  }
 0x1fe   :  { %1118 = shalt.err (!%p1115_p4)
}
 0x1ff   :  { %s1119_s28 = scalar_lea.hbm %s1368_s7, 1024 }
 0x200   :  { %p1120_p5 = scmp.ne.s32.totalorder %s1368_s7, %s1119_s28  ;;  %p1123_p6 = scmp.lt.u32.totalorder %s1119_s28, %s1368_s7 }
 0x202   :  { %p1125_p7 = pnand %p1123_p6, %p1120_p5 }
 0x204   :  { %1128 = shalt.err (!%p1125_p7)
}
 0x205   :  { %s1134_s10 = smov 64   ;;  %s1135_s11 = smov 4  }
 0x206   :  { %847 = dma.vmem_to_hbm [thread:$0]  %s842_s25, 1024, %s1368_s7, [#allocation4], %s1134_s10, %s1134_s10, %s1135_s11  }
 0x207   :  { %1129 = dma.done.wait [#allocation4], 1024  }
 0x208   :  { %1130 = vsyncadd [#allocation4], 4294966272 }
 0x209   :  { %851 = vsyncpa [#allocation4], 1 }

</bundles_post_ra>
